<compile_context>
chip_gen: v5e
topology: v5e:2x2
jax: 0.10.0
libtpu: 0.0.40
codegen_flags: <defaults>
</compile_context>

<pallas_src>
import jax
import jax.numpy as jnp
from jax.experimental import pallas as pl
from jax.experimental.pallas import tpu as pltpu


def _round_up(x, m):
    return ((x + m - 1) // m) * m


def mylinear_kernel(x_ref, w_ref, b_ref, o_ref, acc_ref):
    k = pl.program_id(2)

    @pl.when(k == 0)
    def _init():
        acc_ref[...] = jnp.zeros_like(acc_ref)

    # MXU: bf16 x bf16 -> f32 accumulate.
    acc_ref[...] += jnp.dot(
        x_ref[...], w_ref[...], preferred_element_type=jnp.float32
    )

    @pl.when(k == pl.num_programs(2) - 1)
    def _finalize():
        # Bias add + ReLU epilogue once per output tile (f32 VPU work).
        acc = acc_ref[...] + b_ref[...]            # (1, tn) broadcasts over rows
        o_ref[...] = jnp.maximum(acc, 0.0).astype(o_ref.dtype)


def mylinear(x, w, b, *, tm=256, tn=256, tk=512, compute_dtype=jnp.bfloat16):
    """relu(x @ w + b). x: [B, in_units], w: [in_units, units], b: [units]."""
    B, K = x.shape
    Kw, N = w.shape
    assert K == Kw and b.shape == (N,)

    # Effective tile sizes: no larger than the (aligned) problem dims.
    tm = min(tm, _round_up(B, 8))
    tn = min(tn, _round_up(N, 128))
    tk = min(tk, _round_up(K, 128))

    Mp, Np, Kp = _round_up(B, tm), _round_up(N, tn), _round_up(K, tk)

    # Zero-pad to tile multiples; cast MXU operands to bf16, keep bias in f32.
    xp = jnp.zeros((Mp, Kp), compute_dtype).at[:B, :K].set(x.astype(compute_dtype))
    wp = jnp.zeros((Kp, Np), compute_dtype).at[:K, :N].set(w.astype(compute_dtype))
    bp = jnp.zeros((1, Np), jnp.float32).at[0, :N].set(b.astype(jnp.float32))

    grid = (Mp // tm, Np // tn, Kp // tk)

    cost = pl.CostEstimate(
        flops=2 * Mp * Np * Kp,
        transcendentals=0,
        bytes_accessed=(xp.size * xp.dtype.itemsize
                        + wp.size * wp.dtype.itemsize
                        + bp.size * bp.dtype.itemsize
                        + Mp * Np * 4),
    )

    out = pl.pallas_call(
        mylinear_kernel,
        out_shape=jax.ShapeDtypeStruct((Mp, Np), jnp.float32),
        grid=grid,
        in_specs=[
            pl.BlockSpec((tm, tk), lambda i, j, k: (i, k)),   # X tile
            pl.BlockSpec((tk, tn), lambda i, j, k: (k, j)),   # W tile
            pl.BlockSpec((1, tn), lambda i, j, k: (0, j)),    # bias tile (per N)
        ],
        out_specs=pl.BlockSpec((tm, tn), lambda i, j, k: (i, j)),
        scratch_shapes=[pltpu.VMEM((tm, tn), jnp.float32)],   # f32 accumulator
        compiler_params=pltpu.CompilerParams(
            dimension_semantics=("parallel", "parallel", "arbitrary"),
            vmem_limit_bytes=64 * 1024 * 1024,
        ),
        cost_estimate=cost,
    )(xp, wp, bp)

    return out[:B, :N]


if __name__ == "__main__":
    # MyLinear(in_units=32, units=64), batch of 8 examples.
    key = jax.random.PRNGKey(0)
    k_x, k_w, k_b = jax.random.split(key, 3)

    B, in_units, units = 8, 32, 64
    x = jax.random.normal(k_x, (B, in_units), dtype=jnp.float32)
    w = jax.random.normal(k_w, (in_units, units), dtype=jnp.float32)  # torch.randn(in_units, units)
    b = jax.random.normal(k_b, (units,), dtype=jnp.float32)           # torch.randn(units)

    out = mylinear(x, w, b)
    jax.block_until_ready(out)

    # Correctness check against plain-JAX f32 reference (same semantics as the
    # torch module).  Tolerance is loosened because the MXU inputs are bf16
    # (accumulation stays in f32).
    ref = jnp.maximum(x @ w + b, 0.0)
    assert out.shape == (B, units)
    assert jnp.allclose(out, ref, atol=1e-1, rtol=5e-2)

    print("KERNEL_OK")
</pallas_src>

<mosaic_0001>
module attributes {stable_mosaic.version = 11 : i64} {
  func.func @mylinear_kernel(%arg0: i32, %arg1: i32, %arg2: i32, %arg3: memref<8x128xbf16, #tpu.memory_space<vmem>>, %arg4: memref<128x128xbf16, #tpu.memory_space<vmem>>, %arg5: memref<1x128xf32, #tpu.memory_space<vmem>>, %arg6: memref<8x128xf32, #tpu.memory_space<vmem>>, %arg7: memref<8x128xf32, #tpu.memory_space<vmem>>) attributes {dimension_semantics = [#tpu.dimension_semantics<parallel>, #tpu.dimension_semantics<parallel>, #tpu.dimension_semantics<arbitrary>], iteration_bounds = array<i64: 1, 1, 1>, scalar_prefetch = 0 : i64, scratch_operands = 1 : i64, tpu.core_type = #tpu.core_type<tc>, window_params = [{transform_indices = @transform_0, window_bounds = array<i64: 8, 128>}, {transform_indices = @transform_1, window_bounds = array<i64: 128, 128>}, {transform_indices = @transform_2, window_bounds = array<i64: 1, 128>}, {transform_indices = @transform_3, window_bounds = array<i64: 8, 128>}]} {
    %c0_i32 = arith.constant 0 : i32
    %0 = arith.cmpi eq, %arg2, %c0_i32 : i32
    %1 = arith.extui %0 : i1 to i32
    %c0_i32_0 = arith.constant 0 : i32
    %2 = arith.cmpi ne, %1, %c0_i32_0 : i32
    scf.if %2 {
      %cst_10 = arith.constant 0.000000e+00 : f32
      %12 = vector.broadcast %cst_10 : f32 to vector<8x128xf32>
      %c0_11 = arith.constant 0 : index
      %c0_12 = arith.constant 0 : index
      %13 = vector.load %arg7[%c0_11, %c0_12] : memref<8x128xf32, #tpu.memory_space<vmem>>, vector<8x128xf32>
      tpu.vector_store %arg7[%c0_11, %c0_12], %12 {strides = array<i32>} : memref<8x128xf32, #tpu.memory_space<vmem>>, vector<8x128xf32>,
    } else {
    }
    %c0 = arith.constant 0 : index
    %c0_1 = arith.constant 0 : index
    %3 = vector.load %arg7[%c0, %c0_1] : memref<8x128xf32, #tpu.memory_space<vmem>>, vector<8x128xf32>
    %c0_2 = arith.constant 0 : index
    %c0_3 = arith.constant 0 : index
    %4 = vector.load %arg3[%c0_2, %c0_3] : memref<8x128xbf16, #tpu.memory_space<vmem>>, vector<8x128xbf16>
    %c0_4 = arith.constant 0 : index
    %c0_5 = arith.constant 0 : index
    %5 = vector.load %arg4[%c0_4, %c0_5] : memref<128x128xbf16, #tpu.memory_space<vmem>>, vector<128x128xbf16>
    %cst = arith.constant dense<0.000000e+00> : vector<8x128xf32>
    %6 = tpu.matmul %4, %5, %cst {dimension_numbers = #tpu.dot_dimension_numbers<[1], [0], [0], [1], [0, 0, 1, 1], [], []>} : vector<8x128xbf16>, vector<128x128xbf16>, vector<8x128xf32> -> vector<8x128xf32>
    %7 = arith.addf %3, %6 : vector<8x128xf32>
    %c0_6 = arith.constant 0 : index
    %c0_7 = arith.constant 0 : index
    %8 = vector.load %arg7[%c0_6, %c0_7] : memref<8x128xf32, #tpu.memory_space<vmem>>, vector<8x128xf32>
    tpu.vector_store %arg7[%c0_6, %c0_7], %7 {strides = array<i32>} : memref<8x128xf32, #tpu.memory_space<vmem>>, vector<8x128xf32>,
    %c0_i32_8 = arith.constant 0 : i32
    %9 = arith.cmpi eq, %arg2, %c0_i32_8 : i32
    %10 = arith.extui %9 : i1 to i32
    %c0_i32_9 = arith.constant 0 : i32
    %11 = arith.cmpi ne, %10, %c0_i32_9 : i32
    scf.if %11 {
      %c0_10 = arith.constant 0 : index
      %c0_11 = arith.constant 0 : index
      %12 = vector.load %arg7[%c0_10, %c0_11] : memref<8x128xf32, #tpu.memory_space<vmem>>, vector<8x128xf32>
      %c0_12 = arith.constant 0 : index
      %c0_13 = arith.constant 0 : index
      %13 = vector.load %arg5[%c0_12, %c0_13] : memref<1x128xf32, #tpu.memory_space<vmem>>, vector<1x128xf32>
      %14 = vector.broadcast %13 : vector<1x128xf32> to vector<8x128xf32>
      %15 = arith.addf %12, %14 : vector<8x128xf32>
      %cst_14 = arith.constant 0.000000e+00 : f32
      %16 = vector.broadcast %cst_14 : f32 to vector<8x128xf32>
      %17 = arith.maximumf %15, %16 : vector<8x128xf32>
      %c0_15 = arith.constant 0 : index
      %c0_16 = arith.constant 0 : index
      %18 = vector.load %arg6[%c0_15, %c0_16] : memref<8x128xf32, #tpu.memory_space<vmem>>, vector<8x128xf32>
      tpu.vector_store %arg6[%c0_15, %c0_16], %17 {strides = array<i32>} : memref<8x128xf32, #tpu.memory_space<vmem>>, vector<8x128xf32>,
    } else {
    }
    return
  }
  func.func @transform_0(%arg0: i32, %arg1: i32, %arg2: i32) -> (i32, i32) {
    %c0_i32 = arith.constant 0 : i32
    return %arg0, %arg2 : i32, i32
  }
  func.func @transform_1(%arg0: i32, %arg1: i32, %arg2: i32) -> (i32, i32) {
    %c0_i32 = arith.constant 0 : i32
    return %arg2, %arg1 : i32, i32
  }
  func.func @transform_2(%arg0: i32, %arg1: i32, %arg2: i32) -> (i32, i32) {
    %c0_i32 = arith.constant 0 : i32
    %c0_i32_0 = arith.constant 0 : i32
    return %c0_i32, %arg1 : i32, i32
  }
  func.func @transform_3(%arg0: i32, %arg1: i32, %arg2: i32) -> (i32, i32) {
    %c0_i32 = arith.constant 0 : i32
    return %arg0, %arg1 : i32, i32
  }
}

</mosaic_0001>

<bundles_post_ra>
// kernel: tpu_custom_call.1
= control target key start
LH: loop header
LB: loop body
LE: loop exit
PB: predicated region body
PF: predicated region fallthrough
CT: control target
= control target key end

     0   :  { %8 = vsyncpa [#allocation4], 0  ;;  %s321_s0 = inlined_call_operand.hbm [shape: bf16[8,128], index: 0, kind: input, shape index: {}]   ;;  %s322_s1 = inlined_call_operand.hbm [shape: bf16[128,128], index: 1, kind: input, shape index: {}]   ;;  %s323_s2 = inlined_call_operand.vmem [shape: f32[1,128], index: 2, kind: input, shape index: {}]   ;;  %s324_s3 = inlined_call_operand.hbm [shape: f32[8,128], index: 3, kind: output, shape index: {}]  }
   0x1   :  { %9 = vsyncpa [#allocation7], 0 }
   0x2   :  { %10 = vsyncpa [#allocation5], 0  ;;  %s16_s14 = sshll.u32 %s321_s0, 4  ;;  %s284_s15 = smov [#allocation3]   ;;  %s17_s14 = int_to_ptr.hbm [resolvable:$true] %s16_s14 }
   0x3   :  { %s18_s16 = sshll.u32 %s284_s15, 4  ;;  %s26_s19 = sshll.u32 %s322_s1, 4  ;;  %s19_s16 = int_to_ptr.vmem [resolvable:$true] %s18_s16  ;;  %s27_s19 = int_to_ptr.hbm [resolvable:$true] %s26_s19 }
   0x4   :  { %21 = dma.hbm_to_vmem [thread:$0]  %s17_s14, 64, %s19_s16, [#allocation4]  }
   0x5   :  { %s285_s20 = smov [#allocation6]   ;;  %s286_s22 = smov 64  }
   0x6   :  { %s28_s21 = sshll.u32 %s285_s20, 4  ;;  %s287_s23 = smov 4   ;;  %s29_s21 = int_to_ptr.vmem [resolvable:$true] %s28_s21 }
   0x7   :  { %34 = dma.hbm_to_vmem [thread:$0]  %s27_s19, 1024, %s29_s21, [#allocation7], %s286_s22, %s286_s22, %s287_s23  }
   0x8   :  { %278 = dma.done.wait [#allocation4], 64  }
   0x9   :  { %279 = vsyncadd [#allocation4], 4294967232 }
   0xa   :  { %280 = dma.done.wait [#allocation7], 1024  }
   0xb   :  { %281 = vsyncadd [#allocation7], 4294966272  ;;  %v199_v0 = vld [vmem:[#allocation6 + $0x38] sm:$0xff]  ;;  %v198_v1 = vld [vmem:[#allocation6 + $0x30] sm:$0xff]  ;;  %s288_s24 = smov [#allocation8]   ;;  %s149_s28 = sshll.u32 %s324_s3, 4  ;;  %s150_s28 = int_to_ptr.hbm [resolvable:$true] %s149_s28 }
   0xc   :  { %116 = vmatpush.bf16.msra.mxu0 %v199_v0  ;;  %v197_v2 = vld [vmem:[#allocation6 + $0x28] sm:$0xff]  ;;  %v196_v3 = vld [vmem:[#allocation6 + $0x20] sm:$0xff]  ;;  %v195_v4 = vld [vmem:[#allocation6 + $0x18] sm:$0xff]  ;;  %s147_s25 = sshll.u32 %s288_s24, 4  ;;  %s148_s25 = int_to_ptr.vmem [resolvable:$true] %s147_s25 }
   0xd   :  { %v194_v5 = vld [vmem:[#allocation6 + $0x10] sm:$0xff]  ;;  %v193_v6 = vld [vmem:[#allocation6 + $0x8] sm:$0xff]  ;;  %v192_v7 = vld [vmem:[#allocation6] sm:$0xff] }
   0xe   :  { %v51_v8 = vld [vmem:[#allocation3] sm:$0xf] }
   0xf   :  { %v205_v9 = vld [vmem:[%s323_s2] ss:$0 sm:$0xff] }
  0x10   :  { %117 = vmatpush.bf16.msra.mxu0 %v198_v1 }
  0x14   :  { %118 = vmatpush.bf16.msra.mxu0 %v197_v2 }
  0x18   :  { %119 = vmatpush.bf16.msra.mxu0 %v196_v3 }
  0x1c   :  { %120 = vmatpush.bf16.msra.mxu0 %v195_v4 }
  0x20   :  { %121 = vmatpush.bf16.msra.mxu0 %v194_v5 }
  0x24   :  { %122 = vmatpush.bf16.msra.mxu0 %v193_v6 }
  0x28   :  { %123 = vmatpush.bf16.msra.mxu0 %v192_v7 }
  0x2b   :  { %124 = vmatmul.bf16.vlgmr.msra.gmra.mxu0 %v51_v8 }
  0xa8   :  { %v125_v10 = vpop.f32.mrf.mxu0 }
  0xa9   :  { %v139_v11 = vadd.f32 %v205_v9, %v125_v10 }
  0xab   :  { %v140_v12 = vmax.f32 %v139_v11, 0.0 }
  0xad   :  { %141 = vst [vmem:[#allocation8] sm:$0xff] %v140_v12 }
  0xae   :  { %152 = dma.vmem_to_hbm [thread:$0]  %s148_s25, 128, %s150_s28, [#allocation5]  }
  0xb0   :  { %v127_v13 = vpop.f32.mrf.mxu0 }
  0xb1   :  { %282 = dma.done.wait [#allocation5], 128  }
  0xb2   :  { %283 = vsyncadd [#allocation5], 4294967168 }
  0xb3   :  { %157 = vsyncpa [#allocation4], 1 }
  0xb4   :  { %158 = vsyncpa [#allocation7], 1 }
  0xb5   :  { %159 = vsyncpa [#allocation5], 1 }

</bundles_post_ra>
